<compile_context>
chip_gen: v6e
topology: v6e:2x2x1
jax: 0.10.0
libtpu: 0.0.40
codegen_flags: <defaults>
</compile_context>

<pallas_src>
import functools

import jax
import jax.numpy as jnp
from jax import lax
from jax.experimental import pallas as pl
from jax.experimental.pallas import tpu as pltpu

_LANE = 128
_VMEM_LIMIT = 48 * 1024 * 1024  # safe on v5e/v6e (128 MiB) and v7x (64 MiB)


def _round_up(x, m):
    return (x + m - 1) // m * m


# ---------------------------------------------------------------------------
# Kernel 1: y = act(x @ w + b [+ x2 @ w2] [+ residual])
#   w / w2 are bf16 with BN scale pre-folded; x / x2 cast to bf16 in-kernel;
#   f32 accumulation; bias / residual / ReLU in f32.
# ---------------------------------------------------------------------------
def _mm_kernel(*refs, has_dual, has_res, relu):
    x_ref, w_ref, b_ref = refs[:3]
    pos = 3
    if has_dual:
        x2_ref, w2_ref = refs[pos], refs[pos + 1]
        pos += 2
    if has_res:
        r_ref = refs[pos]
        pos += 1
    o_ref = refs[pos]

    acc = jnp.dot(x_ref[...].astype(jnp.bfloat16), w_ref[...],
                  preferred_element_type=jnp.float32)
    if has_dual:
        acc += jnp.dot(x2_ref[...].astype(jnp.bfloat16), w2_ref[...],
                       preferred_element_type=jnp.float32)
    acc += b_ref[...]
    if has_res:
        acc += r_ref[...]
    if relu:
        acc = jnp.maximum(acc, 0.0)
    o_ref[...] = acc.astype(o_ref.dtype)


def fused_matmul(x, w, bias, *, x2=None, w2=None, residual=None, relu=True):
    """act(x @ w + bias [+ x2 @ w2] [+ residual]).

    x: [M, K] f32/bf16; w: [K, Np] bf16 (Np % 128 == 0, BN scale folded);
    bias: [Np] f32; x2/w2: optional second matmul into the same output tile;
    residual: optional [M, Np] f32.  Returns [M, Np] f32.
    """
    m, k = x.shape
    np_ = w.shape[1]
    assert w.shape[0] == k and np_ % _LANE == 0

    tm = 512 if m >= 512 else _round_up(m, 8)
    mp = _round_up(m, tm)
    tn = 512 if np_ % 512 == 0 else (256 if np_ % 256 == 0 else _LANE)

    def pad_rows(a):
        if a is None or mp == m:
            return a
        return jnp.pad(a, ((0, mp - m), (0, 0)))

    x, x2, residual = pad_rows(x), pad_rows(x2), pad_rows(residual)
    bias2 = bias.reshape(1, np_).astype(jnp.float32)

    in_specs = [
        pl.BlockSpec((tm, k), lambda i, j: (i, 0)),
        pl.BlockSpec((k, tn), lambda i, j: (0, j)),
        pl.BlockSpec((1, tn), lambda i, j: (0, j)),
    ]
    args = [x, w, bias2]
    flops = 2 * mp * k * np_
    bytes_acc = (x.size * x.dtype.itemsize + w.size * 2 + bias2.size * 4
                 + mp * np_ * 4)
    if x2 is not None:
        k2 = x2.shape[1]
        in_specs += [pl.BlockSpec((tm, k2), lambda i, j: (i, 0)),
                     pl.BlockSpec((k2, tn), lambda i, j: (0, j))]
        args += [x2, w2]
        flops += 2 * mp * k2 * np_
        bytes_acc += x2.size * x2.dtype.itemsize + w2.size * 2
    if residual is not None:
        in_specs.append(pl.BlockSpec((tm, tn), lambda i, j: (i, j)))
        args.append(residual)
        bytes_acc += residual.size * 4

    out = pl.pallas_call(
        functools.partial(_mm_kernel, has_dual=x2 is not None,
                          has_res=residual is not None, relu=relu),
        out_shape=jax.ShapeDtypeStruct((mp, np_), jnp.float32),
        grid=(mp // tm, np_ // tn),
        in_specs=in_specs,
        out_specs=pl.BlockSpec((tm, tn), lambda i, j: (i, j)),
        compiler_params=pltpu.CompilerParams(
            dimension_semantics=("parallel", "parallel"),
            vmem_limit_bytes=_VMEM_LIMIT),
        cost_estimate=pl.CostEstimate(flops=flops, transcendentals=0,
                                      bytes_accessed=bytes_acc),
    )(*args)
    return out if mp == m else out[:m]


# ---------------------------------------------------------------------------
# Kernel 2: fused 3x3 / stride-1 / pad-1 conv + folded-BN bias + ReLU.
#   grid = (batch, out_row, ky); the kx taps are unrolled in-kernel and the
#   9 tap matmuls accumulate into a VMEM f32 scratch (no im2col in HBM).
# ---------------------------------------------------------------------------
def _conv3x3_s1_kernel(x_ref, w_ref, b_ref, o_ref, acc_ref, *, wo, cp):
    ky = pl.program_id(2)

    @pl.when(ky == 0)
    def _():
        acc_ref[...] = jnp.zeros_like(acc_ref)

    for kx in range(3):
        tap = pl.multiple_of((ky * 3 + kx) * cp, cp)
        x_tap = x_ref[kx:kx + wo, :].astype(jnp.bfloat16)          # (Wo, Cp)
        acc_ref[...] += jnp.dot(x_tap, w_ref[pl.ds(tap, cp), :],
                                preferred_element_type=jnp.float32)

    @pl.when(ky == 2)
    def _():
        o_ref[...] = jnp.maximum(acc_ref[...] + b_ref[...], 0.0).astype(o_ref.dtype)


def conv3x3_s1_fused(x_nhwc, w_flat, bias):
    """x_nhwc: (N, H, W, Cp) f32 with Cp % 128 == 0.
    w_flat: (9*Cp, Np) bf16 with rows ordered (ky, kx, cin), BN scale folded.
    bias: (Np,) f32.  Returns relu(conv3x3(x, stride=1, pad=1) + bias): (N,H,W,Np) f32."""
    n, h, w, cp = x_nhwc.shape
    np_ = w_flat.shape[1]
    xp = jnp.pad(x_nhwc, ((0, 0), (1, 1), (1, 1), (0, 0)))
    wp = w + 2
    bias2 = bias.reshape(1, np_).astype(jnp.float32)

    flops = 2 * n * h * w * (9 * cp) * np_
    bytes_acc = 3 * xp.size * 4 + w_flat.size * 2 + n * h * w * np_ * 4

    return pl.pallas_call(
        functools.partial(_conv3x3_s1_kernel, wo=w, cp=cp),
        out_shape=jax.ShapeDtypeStruct((n, h, w, np_), jnp.float32),
        grid=(n, h, 3),
        in_specs=[
            pl.BlockSpec((None, None, wp, cp), lambda b, y, ky: (b, y + ky, 0, 0)),
            pl.BlockSpec((9 * cp, np_), lambda b, y, ky: (0, 0)),  # resident weight
            pl.BlockSpec((1, np_), lambda b, y, ky: (0, 0)),
        ],
        out_specs=pl.BlockSpec((None, None, w, np_), lambda b, y, ky: (b, y, 0, 0)),
        scratch_shapes=[pltpu.VMEM((w, np_), jnp.float32)],
        compiler_params=pltpu.CompilerParams(
            dimension_semantics=("parallel", "parallel", "arbitrary"),
            vmem_limit_bytes=_VMEM_LIMIT),
        cost_estimate=pl.CostEstimate(flops=flops, transcendentals=0,
                                      bytes_accessed=bytes_acc),
    )(xp, w_flat, bias2)


# ---------------------------------------------------------------------------
# BN folding, weight prep, im2col fallback
# ---------------------------------------------------------------------------
def _fold_bn(gamma, beta, mean, var, eps=1e-5):
    scale = gamma / jnp.sqrt(var + eps)
    return scale, beta - mean * scale


def _bn(params, pre):
    return (params[f"{pre}_gamma"], params[f"{pre}_beta"],
            params[f"{pre}_mean"], params[f"{pre}_var"])


def _prep_1x1(w_oihw, bn, n_pad, k_pad=None):
    """Fold BN scale into a 1x1 conv weight -> (Kp, Np) bf16 + (Np,) f32 bias."""
    scale, bias = _fold_bn(*bn)
    wm = w_oihw[:, :, 0, 0].T * scale[None, :]            # (K, N)
    k, n = wm.shape
    kp = k if k_pad is None else k_pad
    wm = jnp.pad(wm, ((0, kp - k), (0, n_pad - n)))
    return (wm.astype(jnp.bfloat16),
            jnp.pad(bias, (0, n_pad - n)).astype(jnp.float32))


def _prep_3x3(w_oihw, bn, c_pad, n_pad):
    """Fold BN into the 3x3 conv weight -> (9*Cp, Np) bf16 (rows: ky, kx, cin)."""
    scale, bias = _fold_bn(*bn)
    wt = jnp.transpose(w_oihw, (2, 3, 1, 0)) * scale      # (3, 3, Cin, Cout)
    _, _, ci, co = wt.shape
    wt = jnp.pad(wt, ((0, 0), (0, 0), (0, c_pad - ci), (0, n_pad - co)))
    wt = wt.reshape(9 * c_pad, n_pad)
    return (wt.astype(jnp.bfloat16),
            jnp.pad(bias, (0, n_pad - co)).astype(jnp.float32))


def _im2col_3x3(x_nhwc, stride):
    """bf16 im2col for the strided 3x3 path (pad=1); (ky, kx, cin) ordering."""
    n, h, w, c = x_nhwc.shape
    xp = jnp.pad(x_nhwc.astype(jnp.bfloat16), ((0, 0), (1, 1), (1, 1), (0, 0)))
    ho = (h - 1) // stride + 1
    wo = (w - 1) // stride + 1
    cols = []
    for ky in range(3):
        for kx in range(3):
            cols.append(xp[:, ky:ky + (ho - 1) * stride + 1:stride,
                           kx:kx + (wo - 1) * stride + 1:stride, :])
    return jnp.concatenate(cols, axis=-1), ho, wo


# ---------------------------------------------------------------------------
# Bottleneck forward (matches the nn.Module, inference-mode BN)
# ---------------------------------------------------------------------------
def bottleneck_forward(x_nchw, params, stride=1, downsample=False):
    expansion = 4
    x = jnp.transpose(x_nchw, (0, 2, 3, 1)).astype(jnp.float32)   # NHWC
    n, h, w, cin = x.shape
    planes = params["w1"].shape[0]
    cp = _round_up(planes, _LANE)                 # padded conv1/conv2 width
    np3 = _round_up(planes * expansion, _LANE)    # padded conv3 width

    # conv1 (1x1) + bn1 + relu
    w1f, b1 = _prep_1x1(params["w1"], _bn(params, "bn1"), cp)
    out1 = fused_matmul(x.reshape(n * h * w, cin), w1f, b1, relu=True)
    out1 = out1.reshape(n, h, w, cp)

    # conv2 (3x3, stride, pad=1) + bn2 + relu
    w2f, b2 = _prep_3x3(params["w2"], _bn(params, "bn2"), cp, cp)
    if stride == 1:
        out2 = conv3x3_s1_fused(out1, w2f, b2)
        ho, wo = h, w
        out2 = out2.reshape(n * ho * wo, cp)
    else:
        # TODO(synk): stride>1 3x3 still goes through a (bf16) im2col
        # materialization; fully fused strided tap selection not implemented.
        patches, ho, wo = _im2col_3x3(out1, stride)
        out2 = fused_matmul(patches.reshape(n * ho * wo, 9 * cp), w2f, b2,
                            relu=True)

    # conv3 (1x1) + bn3 + residual branch + relu, fused in ONE kernel call
    w3f, b3 = _prep_1x1(params["w3"], _bn(params, "bn3"), np3, k_pad=cp)
    if downsample:
        wdf, bd = _prep_1x1(params["wd"], _bn(params, "bnd"), np3)
        xd = x[:, ::stride, ::stride, :].reshape(n * ho * wo, cin)
        out3 = fused_matmul(out2, w3f, b3 + bd, x2=xd, w2=wdf, relu=True)
    else:
        assert stride == 1 and cin == planes * expansion, \
            "identity residual needs stride=1 and inplanes == planes*4"
        res = jnp.pad(x.reshape(n * h * w, cin), ((0, 0), (0, np3 - cin)))
        out3 = fused_matmul(out2, w3f, b3, residual=res, relu=True)

    out3 = out3.reshape(n, ho, wo, np3)[..., :planes * expansion]
    return jnp.transpose(out3, (0, 3, 1, 2))      # NCHW


# ---------------------------------------------------------------------------
# Deterministic parameter init (shapes from Bottleneck.__init__, PyTorch OIHW)
# ---------------------------------------------------------------------------
def init_params(key, inplanes, planes, downsample):
    expansion = 4
    ks = jax.random.split(key, 8)

    def conv_w(k, cout, cin, kh, kw):
        return jax.random.normal(k, (cout, cin, kh, kw), jnp.float32) * 0.1

    def bn_p(k, c):
        k1, k2, k3, k4 = jax.random.split(k, 4)
        return dict(
            gamma=jax.random.uniform(k1, (c,), jnp.float32, 0.5, 1.5),
            beta=jax.random.normal(k2, (c,), jnp.float32) * 0.1,
            mean=jax.random.normal(k3, (c,), jnp.float32) * 0.1,
            var=jax.random.uniform(k4, (c,), jnp.float32, 0.5, 1.5),
        )

    p = {}
    p["w1"] = conv_w(ks[0], planes, inplanes, 1, 1)
    p["w2"] = conv_w(ks[1], planes, planes, 3, 3)
    p["w3"] = conv_w(ks[2], planes * expansion, planes, 1, 1)
    for name, kk, c in (("bn1", ks[3], planes),
                        ("bn2", ks[4], planes),
                        ("bn3", ks[5], planes * expansion)):
        bp = bn_p(kk, c)
        p[f"{name}_gamma"], p[f"{name}_beta"] = bp["gamma"], bp["beta"]
        p[f"{name}_mean"], p[f"{name}_var"] = bp["mean"], bp["var"]
    if downsample:
        p["wd"] = conv_w(ks[6], planes * expansion, inplanes, 1, 1)
        bp = bn_p(ks[7], planes * expansion)
        p["bnd_gamma"], p["bnd_beta"] = bp["gamma"], bp["beta"]
        p["bnd_mean"], p["bnd_var"] = bp["mean"], bp["var"]
    return p


# ---------------------------------------------------------------------------
# References: pure-f32 module semantics, and a precision-matched (bf16-operand,
# BN-folded) reference for a tight kernel-correctness check.
# ---------------------------------------------------------------------------
def reference_forward(x_nchw, params, stride, downsample, eps=1e-5):
    x = jnp.transpose(x_nchw, (0, 2, 3, 1)).astype(jnp.float32)

    def conv(inp, w, s=1, pad=0):
        return lax.conv_general_dilated(
            inp, jnp.transpose(w, (2, 3, 1, 0)),
            window_strides=(s, s), padding=((pad, pad), (pad, pad)),
            dimension_numbers=("NHWC", "HWIO", "NHWC"))

    def bn(inp, pre):
        g, b = params[f"{pre}_gamma"], params[f"{pre}_beta"]
        m, v = params[f"{pre}_mean"], params[f"{pre}_var"]
        return (inp - m) / jnp.sqrt(v + eps) * g + b

    out = jax.nn.relu(bn(conv(x, params["w1"]), "bn1"))
    out = jax.nn.relu(bn(conv(out, params["w2"], s=stride, pad=1), "bn2"))
    out = bn(conv(out, params["w3"]), "bn3")
    res = bn(conv(x, params["wd"], s=stride), "bnd") if downsample else x
    return jnp.transpose(jax.nn.relu(out + res), (0, 3, 1, 2))


def reference_forward_matched(x_nchw, params, stride, downsample, eps=1e-5):
    """Same math as the Pallas pipeline: folded BN, bf16 conv operands, f32 acc."""
    x = jnp.transpose(x_nchw, (0, 2, 3, 1)).astype(jnp.float32)

    def fold(pre):
        s = params[f"{pre}_gamma"] / jnp.sqrt(params[f"{pre}_var"] + eps)
        return s, params[f"{pre}_beta"] - params[f"{pre}_mean"] * s

    def conv(inp, w_oihw, scale, s=1, pad=0):
        wf = (jnp.transpose(w_oihw, (2, 3, 1, 0)) * scale).astype(jnp.bfloat16)
        return lax.conv_general_dilated(
            inp.astype(jnp.bfloat16), wf, (s, s), ((pad, pad), (pad, pad)),
            dimension_numbers=("NHWC", "HWIO", "NHWC"),
            preferred_element_type=jnp.float32)

    s1, b1 = fold("bn1")
    s2, b2 = fold("bn2")
    s3, b3 = fold("bn3")
    out = jax.nn.relu(conv(x, params["w1"], s1) + b1)
    out = jax.nn.relu(conv(out, params["w2"], s2, s=stride, pad=1) + b2)
    out = conv(out, params["w3"], s3) + b3
    if downsample:
        sd, bd = fold("bnd")
        res = conv(x, params["wd"], sd, s=stride) + bd
    else:
        res = x
    return jnp.transpose(jax.nn.relu(out + res), (0, 3, 1, 2))


if __name__ == "__main__":
    key = jax.random.PRNGKey(0)
    kx, kp1, kp2 = jax.random.split(key, 3)

    # Config A: downsampling bottleneck (stride=2, channel expansion).
    inplanes, planes, stride, downsample = 16, 8, 2, True
    x = jax.random.normal(kx, (2, inplanes, 8, 8), jnp.float32)
    params = init_params(kp1, inplanes, planes, downsample)
    fwd_a = jax.jit(lambda a, p: bottleneck_forward(a, p, stride, downsample))
    out = jax.block_until_ready(fwd_a(x, params))
    assert out.shape == (2, planes * 4, 4, 4)
    ref_m = reference_forward_matched(x, params, stride, downsample)
    ref = reference_forward(x, params, stride, downsample)
    # Tight check vs the precision-matched (bf16-operand, folded-BN) reference.
    assert jnp.allclose(out, ref_m, atol=5e-3, rtol=5e-3)
    # Loose check vs pure-f32 module semantics (bf16 MXU operands per review).
    assert jnp.allclose(out, ref, atol=8e-2, rtol=8e-2)

    # Config B: identity-residual bottleneck (stride=1, inplanes == planes*4).
    inplanes2, planes2 = 32, 8
    x2 = jax.random.normal(kx, (2, inplanes2, 8, 8), jnp.float32)
    params2 = init_params(kp2, inplanes2, planes2, False)
    fwd_b = jax.jit(lambda a, p: bottleneck_forward(a, p, 1, False))
    out2 = jax.block_until_ready(fwd_b(x2, params2))
    assert out2.shape == (2, planes2 * 4, 8, 8)
    ref2_m = reference_forward_matched(x2, params2, 1, False)
    ref2 = reference_forward(x2, params2, 1, False)
    assert jnp.allclose(out2, ref2_m, atol=5e-3, rtol=5e-3)
    assert jnp.allclose(out2, ref2, atol=8e-2, rtol=8e-2)

    print("KERNEL_OK")
</pallas_src>

<mosaic_0001>
module attributes {stable_mosaic.version = 11 : i64} {
  func.func @_mm_kernel(%arg0: i32, %arg1: i32, %arg2: memref<128x16xf32, #tpu.memory_space<vmem>>, %arg3: memref<16x128xbf16, #tpu.memory_space<vmem>>, %arg4: memref<1x128xf32, #tpu.memory_space<vmem>>, %arg5: memref<128x128xf32, #tpu.memory_space<vmem>>) attributes {dimension_semantics = [#tpu.dimension_semantics<parallel>, #tpu.dimension_semantics<parallel>], iteration_bounds = array<i64: 1, 1>, scalar_prefetch = 0 : i64, scratch_operands = 0 : i64, tpu.core_type = #tpu.core_type<tc>, window_params = [{transform_indices = @transform_0, window_bounds = array<i64: 128, 16>}, {transform_indices = @transform_1, window_bounds = array<i64: 16, 128>}, {transform_indices = @transform_2, window_bounds = array<i64: 1, 128>}, {transform_indices = @transform_3, window_bounds = array<i64: 128, 128>}]} {
    %c0 = arith.constant 0 : index
    %c0_0 = arith.constant 0 : index
    %0 = vector.load %arg2[%c0, %c0_0] : memref<128x16xf32, #tpu.memory_space<vmem>>, vector<128x16xf32>
    %1 = arith.truncf %0 : vector<128x16xf32> to vector<128x16xbf16>
    %c0_1 = arith.constant 0 : index
    %c0_2 = arith.constant 0 : index
    %2 = vector.load %arg3[%c0_1, %c0_2] : memref<16x128xbf16, #tpu.memory_space<vmem>>, vector<16x128xbf16>
    %cst = arith.constant dense<0.000000e+00> : vector<128x128xf32>
    %3 = tpu.matmul %1, %2, %cst {dimension_numbers = #tpu.dot_dimension_numbers<[1], [0], [0], [1], [0, 0, 1, 1], [], []>} : vector<128x16xbf16>, vector<16x128xbf16>, vector<128x128xf32> -> vector<128x128xf32>
    %c0_3 = arith.constant 0 : index
    %c0_4 = arith.constant 0 : index
    %4 = vector.load %arg4[%c0_3, %c0_4] : memref<1x128xf32, #tpu.memory_space<vmem>>, vector<1x128xf32>
    %5 = vector.broadcast %4 : vector<1x128xf32> to vector<128x128xf32>
    %6 = arith.addf %3, %5 : vector<128x128xf32>
    %cst_5 = arith.constant 0.000000e+00 : f32
    %7 = vector.broadcast %cst_5 : f32 to vector<128x128xf32>
    %8 = arith.maximumf %6, %7 : vector<128x128xf32>
    %c0_6 = arith.constant 0 : index
    %c0_7 = arith.constant 0 : index
    %9 = vector.load %arg5[%c0_6, %c0_7] : memref<128x128xf32, #tpu.memory_space<vmem>>, vector<128x128xf32>
    tpu.vector_store %arg5[%c0_6, %c0_7], %8 {strides = array<i32>} : memref<128x128xf32, #tpu.memory_space<vmem>>, vector<128x128xf32>,
    return
  }
  func.func @transform_0(%arg0: i32, %arg1: i32) -> (i32, i32) {
    %c0_i32 = arith.constant 0 : i32
    %c0_i32_0 = arith.constant 0 : i32
    return %arg0, %c0_i32 : i32, i32
  }
  func.func @transform_1(%arg0: i32, %arg1: i32) -> (i32, i32) {
    %c0_i32 = arith.constant 0 : i32
    %c0_i32_0 = arith.constant 0 : i32
    return %c0_i32, %arg1 : i32, i32
  }
  func.func @transform_2(%arg0: i32, %arg1: i32) -> (i32, i32) {
    %c0_i32 = arith.constant 0 : i32
    %c0_i32_0 = arith.constant 0 : i32
    return %c0_i32, %arg1 : i32, i32
  }
  func.func @transform_3(%arg0: i32, %arg1: i32) -> (i32, i32) {
    %c0_i32 = arith.constant 0 : i32
    return %arg0, %arg1 : i32, i32
  }
}

module attributes {stable_mosaic.version = 11 : i64} {
  func.func @_mm_kernel(%arg0: i32, %arg1: i32, %arg2: memref<32x1152xbf16, #tpu.memory_space<vmem>>, %arg3: memref<1152x128xbf16, #tpu.memory_space<vmem>>, %arg4: memref<1x128xf32, #tpu.memory_space<vmem>>, %arg5: memref<32x128xf32, #tpu.memory_space<vmem>>) attributes {dimension_semantics = [#tpu.dimension_semantics<parallel>, #tpu.dimension_semantics<parallel>], iteration_bounds = array<i64: 1, 1>, scalar_prefetch = 0 : i64, scratch_operands = 0 : i64, tpu.core_type = #tpu.core_type<tc>, window_params = [{transform_indices = @transform_0, window_bounds = array<i64: 32, 1152>}, {transform_indices = @transform_1, window_bounds = array<i64: 1152, 128>}, {transform_indices = @transform_2, window_bounds = array<i64: 1, 128>}, {transform_indices = @transform_3, window_bounds = array<i64: 32, 128>}]} {
    %c0 = arith.constant 0 : index
    %c0_0 = arith.constant 0 : index
    %0 = vector.load %arg2[%c0, %c0_0] : memref<32x1152xbf16, #tpu.memory_space<vmem>>, vector<32x1152xbf16>
    %c0_1 = arith.constant 0 : index
    %c0_2 = arith.constant 0 : index
    %1 = vector.load %arg3[%c0_1, %c0_2] : memref<1152x128xbf16, #tpu.memory_space<vmem>>, vector<1152x128xbf16>
    %cst = arith.constant dense<0.000000e+00> : vector<32x128xf32>
    %2 = tpu.matmul %0, %1, %cst {dimension_numbers = #tpu.dot_dimension_numbers<[1], [0], [0], [1], [0, 0, 1, 1], [], []>} : vector<32x1152xbf16>, vector<1152x128xbf16>, vector<32x128xf32> -> vector<32x128xf32>
    %c0_3 = arith.constant 0 : index
    %c0_4 = arith.constant 0 : index
    %3 = vector.load %arg4[%c0_3, %c0_4] : memref<1x128xf32, #tpu.memory_space<vmem>>, vector<1x128xf32>
    %4 = vector.broadcast %3 : vector<1x128xf32> to vector<32x128xf32>
    %5 = arith.addf %2, %4 : vector<32x128xf32>
    %cst_5 = arith.constant 0.000000e+00 : f32
    %6 = vector.broadcast %cst_5 : f32 to vector<32x128xf32>
    %7 = arith.maximumf %5, %6 : vector<32x128xf32>
    %c0_6 = arith.constant 0 : index
    %c0_7 = arith.constant 0 : index
    %8 = vector.load %arg5[%c0_6, %c0_7] : memref<32x128xf32, #tpu.memory_space<vmem>>, vector<32x128xf32>
    tpu.vector_store %arg5[%c0_6, %c0_7], %7 {strides = array<i32>} : memref<32x128xf32, #tpu.memory_space<vmem>>, vector<32x128xf32>,
    return
  }
  func.func @transform_0(%arg0: i32, %arg1: i32) -> (i32, i32) {
    %c0_i32 = arith.constant 0 : i32
    %c0_i32_0 = arith.constant 0 : i32
    return %arg0, %c0_i32 : i32, i32
  }
  func.func @transform_1(%arg0: i32, %arg1: i32) -> (i32, i32) {
    %c0_i32 = arith.constant 0 : i32
    %c0_i32_0 = arith.constant 0 : i32
    return %c0_i32, %arg1 : i32, i32
  }
  func.func @transform_2(%arg0: i32, %arg1: i32) -> (i32, i32) {
    %c0_i32 = arith.constant 0 : i32
    %c0_i32_0 = arith.constant 0 : i32
    return %c0_i32, %arg1 : i32, i32
  }
  func.func @transform_3(%arg0: i32, %arg1: i32) -> (i32, i32) {
    %c0_i32 = arith.constant 0 : i32
    return %arg0, %arg1 : i32, i32
  }
}

module attributes {stable_mosaic.version = 11 : i64} {
  func.func @_mm_kernel(%arg0: i32, %arg1: i32, %arg2: memref<32x128xf32, #tpu.memory_space<vmem>>, %arg3: memref<128x128xbf16, #tpu.memory_space<vmem>>, %arg4: memref<1x128xf32, #tpu.memory_space<vmem>>, %arg5: memref<32x16xf32, #tpu.memory_space<vmem>>, %arg6: memref<16x128xbf16, #tpu.memory_space<vmem>>, %arg7: memref<32x128xf32, #tpu.memory_space<vmem>>) attributes {dimension_semantics = [#tpu.dimension_semantics<parallel>, #tpu.dimension_semantics<parallel>], iteration_bounds = array<i64: 1, 1>, scalar_prefetch = 0 : i64, scratch_operands = 0 : i64, tpu.core_type = #tpu.core_type<tc>, window_params = [{transform_indices = @transform_0, window_bounds = array<i64: 32, 128>}, {transform_indices = @transform_1, window_bounds = array<i64: 128, 128>}, {transform_indices = @transform_2, window_bounds = array<i64: 1, 128>}, {transform_indices = @transform_3, window_bounds = array<i64: 32, 16>}, {transform_indices = @transform_4, window_bounds = array<i64: 16, 128>}, {transform_indices = @transform_5, window_bounds = array<i64: 32, 128>}]} {
    %c0 = arith.constant 0 : index
    %c0_0 = arith.constant 0 : index
    %0 = vector.load %arg2[%c0, %c0_0] : memref<32x128xf32, #tpu.memory_space<vmem>>, vector<32x128xf32>
    %1 = arith.truncf %0 : vector<32x128xf32> to vector<32x128xbf16>
    %c0_1 = arith.constant 0 : index
    %c0_2 = arith.constant 0 : index
    %2 = vector.load %arg3[%c0_1, %c0_2] : memref<128x128xbf16, #tpu.memory_space<vmem>>, vector<128x128xbf16>
    %cst = arith.constant dense<0.000000e+00> : vector<32x128xf32>
    %3 = tpu.matmul %1, %2, %cst {dimension_numbers = #tpu.dot_dimension_numbers<[1], [0], [0], [1], [0, 0, 1, 1], [], []>} : vector<32x128xbf16>, vector<128x128xbf16>, vector<32x128xf32> -> vector<32x128xf32>
    %c0_3 = arith.constant 0 : index
    %c0_4 = arith.constant 0 : index
    %4 = vector.load %arg5[%c0_3, %c0_4] : memref<32x16xf32, #tpu.memory_space<vmem>>, vector<32x16xf32>
    %5 = arith.truncf %4 : vector<32x16xf32> to vector<32x16xbf16>
    %c0_5 = arith.constant 0 : index
    %c0_6 = arith.constant 0 : index
    %6 = vector.load %arg6[%c0_5, %c0_6] : memref<16x128xbf16, #tpu.memory_space<vmem>>, vector<16x128xbf16>
    %cst_7 = arith.constant dense<0.000000e+00> : vector<32x128xf32>
    %7 = tpu.matmul %5, %6, %cst_7 {dimension_numbers = #tpu.dot_dimension_numbers<[1], [0], [0], [1], [0, 0, 1, 1], [], []>} : vector<32x16xbf16>, vector<16x128xbf16>, vector<32x128xf32> -> vector<32x128xf32>
    %8 = arith.addf %3, %7 : vector<32x128xf32>
    %c0_8 = arith.constant 0 : index
    %c0_9 = arith.constant 0 : index
    %9 = vector.load %arg4[%c0_8, %c0_9] : memref<1x128xf32, #tpu.memory_space<vmem>>, vector<1x128xf32>
    %10 = vector.broadcast %9 : vector<1x128xf32> to vector<32x128xf32>
    %11 = arith.addf %8, %10 : vector<32x128xf32>
    %cst_10 = arith.constant 0.000000e+00 : f32
    %12 = vector.broadcast %cst_10 : f32 to vector<32x128xf32>
    %13 = arith.maximumf %11, %12 : vector<32x128xf32>
    %c0_11 = arith.constant 0 : index
    %c0_12 = arith.constant 0 : index
    %14 = vector.load %arg7[%c0_11, %c0_12] : memref<32x128xf32, #tpu.memory_space<vmem>>, vector<32x128xf32>
    tpu.vector_store %arg7[%c0_11, %c0_12], %13 {strides = array<i32>} : memref<32x128xf32, #tpu.memory_space<vmem>>, vector<32x128xf32>,
    return
  }
  func.func @transform_0(%arg0: i32, %arg1: i32) -> (i32, i32) {
    %c0_i32 = arith.constant 0 : i32
    %c0_i32_0 = arith.constant 0 : i32
    return %arg0, %c0_i32 : i32, i32
  }
  func.func @transform_1(%arg0: i32, %arg1: i32) -> (i32, i32) {
    %c0_i32 = arith.constant 0 : i32
    %c0_i32_0 = arith.constant 0 : i32
    return %c0_i32, %arg1 : i32, i32
  }
  func.func @transform_2(%arg0: i32, %arg1: i32) -> (i32, i32) {
    %c0_i32 = arith.constant 0 : i32
    %c0_i32_0 = arith.constant 0 : i32
    return %c0_i32, %arg1 : i32, i32
  }
  func.func @transform_3(%arg0: i32, %arg1: i32) -> (i32, i32) {
    %c0_i32 = arith.constant 0 : i32
    %c0_i32_0 = arith.constant 0 : i32
    return %arg0, %c0_i32 : i32, i32
  }
  func.func @transform_4(%arg0: i32, %arg1: i32) -> (i32, i32) {
    %c0_i32 = arith.constant 0 : i32
    %c0_i32_0 = arith.constant 0 : i32
    return %c0_i32, %arg1 : i32, i32
  }
  func.func @transform_5(%arg0: i32, %arg1: i32) -> (i32, i32) {
    %c0_i32 = arith.constant 0 : i32
    return %arg0, %arg1 : i32, i32
  }
}

</mosaic_0001>

<bundles_post_ra>
// kernel: _lambda_.3
= control target key start
LH: loop header
LB: loop body
LE: loop exit
PB: predicated region body
PF: predicated region fallthrough
CT: control target
= control target key end

     0   :  { %8 = vsyncpa [#allocation3], 0  ;;  %s292_s12 = smov [#allocation2]   ;;  %s380_s0 = inlined_call_operand.hbm [shape: f32[128,16], index: 0, kind: input, shape index: {}]   ;;  %s381_s1 = inlined_call_operand.vmem [shape: bf16[16,128], index: 1, kind: input, shape index: {}]   ;;  %s382_s2 = inlined_call_operand.vmem [shape: f32[1,128], index: 2, kind: input, shape index: {}]   ;;  %s383_s3 = inlined_call_operand.vmem [shape: f32[128,128], index: 3, kind: output, shape index: {}]  }
   0x1   :  { %s14_s13 = sshll.u32 %s292_s12, 4  ;;  %s15_s13 = int_to_ptr.vmem [resolvable:$true] %s14_s13 }
   0x2   :  { %s278_s14 = scalar_lea.vmem %s15_s13, 2048  ;;  %p283_p1 = scmp.lt.s32.totalorder %s15_s13, %s15_s13 }
   0x3   :  { %p279_p0 = scmp.ne.s32.totalorder %s15_s13, %s278_s14  ;;  %p284_p2 = scmp.lt.s32.totalorder %s278_s14, %s278_s14 }
   0x5   :  { %p285_p3 = por %p284_p2, %p283_p1 }
   0x7   :  { %p286_p4 = pnand %p285_p3, %p279_p0 }
   0x9   :  { %289 = shalt.err (!%p286_p4)
}
   0xa   :  { %s293_s15 = smov 128   ;;  %s294_s16 = smov 8  }
   0xb   :  { %20 = dma.hbm_to_vmem [thread:$0]  %s380_s0, 2048, %s15_s13, [#allocation3], %s293_s15, %s293_s15, %s294_s16  }
   0xc   :  { %290 = dma.done.wait [#allocation3], 2048  }
   0xd   :  { %291 = vsyncadd [#allocation3], 4294965248  ;;  %v269_v0 = vld [vmem:[%s381_s1] sm:$0xff]   ;;  %v30_v2 = vld [vmem:[#allocation2 + $0x8] sm:$0xff]  ;;  %vm68_vm0 = vcmask 130048  }
   0xe   :  { %v29_v1 = vld [vmem:[#allocation2] sm:$0xff]  ;;  %246 = vmatprep.subr.bf16.mxu0 %v269_v0  ;;  %264 = vmatprep.subr.bf16.mxu1 %v269_v0  ;;  %v38_v5 = vld [vmem:[#allocation2 + $0x48] sm:$0xff]  ;;  %v31_v6 = vld [vmem:[#allocation2 + $0x10] sm:$0xff] }
   0xf   :  { %v37_v3 = vld [vmem:[#allocation2 + $0x40] sm:$0xff]  ;;  %v45_v4 = vpack.c.bf16 %v30_v2, %v29_v1  ;;  %v32_v7 = vld [vmem:[#allocation2 + $0x18] sm:$0xff]  ;;  %247 = vmatpush3.bf16.msra.mxu0 %v269_v0  ;;  %265 = vmatpush3.bf16.msra.mxu1 %v269_v0  ;;  %v39_v10 = vld [vmem:[#allocation2 + $0x50] sm:$0xff] }
  0x10   :  { %v49_v8 = vpack.c.bf16 %v38_v5, %v37_v3  ;;  %v46_v9 = vpack.c.bf16 %v32_v7, %v31_v6  ;;  %v40_v11 = vld [vmem:[#allocation2 + $0x58] sm:$0xff]  ;;  %v33_v12 = vld [vmem:[#allocation2 + $0x20] sm:$0xff]  ;;  %v34_v14 = vld [vmem:[#allocation2 + $0x28] sm:$0xff] }
  0x11   :  { %248 = vmatprep.mubr.msk.bf16.mxu0 %vm68_vm0, %v45_v4  ;;  %v50_v13 = vpack.c.bf16 %v40_v11, %v39_v10  ;;  %v41_v15 = vld [vmem:[#allocation2 + $0x60] sm:$0xff]  ;;  %v42_v16 = vld [vmem:[#allocation2 + $0x68] sm:$0xff]  ;;  %v47_v17 = vpack.c.bf16 %v34_v14, %v33_v12  ;;  %v35_v19 = vld [vmem:[#allocation2 + $0x30] sm:$0xff] }
  0x12   :  { %256 = vmatprep.mubr.msk.bf16.mxu1 %vm68_vm0, %v49_v8  ;;  %v51_v18 = vpack.c.bf16 %v42_v16, %v41_v15  ;;  %249 = vmatmul.mubr.msk.bf16.vlgmr.msra.gmra.mxu0 %vm68_vm0, %v46_v9  ;;  %v36_v20 = vld [vmem:[#allocation2 + $0x38] sm:$0xff]  ;;  %v43_v21 = vld [vmem:[#allocation2 + $0x70] sm:$0xff]  ;;  %v227_v25 = vld [vmem:[%s382_s2] ss:$0 sm:$0xff] }
  0x13   :  { %257 = vmatmul.mubr.msk.bf16.vlgmr.msra.gmra.mxu1 %vm68_vm0, %v50_v13  ;;  %252 = vmatprep.mubr.msk.bf16.mxu0 %vm68_vm0, %v47_v17  ;;  %v44_v22 = vld [vmem:[#allocation2 + $0x78] sm:$0xff]  ;;  %v48_v23 = vpack.c.bf16 %v36_v20, %v35_v19 }
  0x14   :  { %260 = vmatprep.mubr.msk.bf16.mxu1 %vm68_vm0, %v51_v18  ;;  %v52_v24 = vpack.c.bf16 %v44_v22, %v43_v21 }
  0x1a   :  { %253 = vmatmul.mubr.msk.bf16.gmra.mxu0 %vm68_vm0, %v48_v23 }
  0x1b   :  { %261 = vmatmul.mubr.msk.bf16.gmra.mxu1 %vm68_vm0, %v52_v24 }
  0xd2   :  { %v250_v26 = vpop.f32.mrf.mxu0 }
  0xd3   :  { %v258_v27 = vpop.f32.mrf.mxu1  ;;  %v136_v28 = vadd.f32 %v250_v26, %v227_v25 }
  0xd4   :  { %v168_v29 = vadd.f32 %v258_v27, %v227_v25  ;;  %v127_v30 = vpop.f32.mrf.mxu0 }
  0xd5   :  { %v159_v31 = vpop.f32.mrf.mxu1  ;;  %v192_v32 = vmax.f32 %v136_v28, 0.0  ;;  %v128_v34 = vadd.f32 %v227_v25, %v127_v30 }
  0xd6   :  { %v200_v33 = vmax.f32 %v168_v29, 0.0  ;;  %v160_v35 = vadd.f32 %v227_v25, %v159_v31  ;;  %v251_v36 = vpop.f32.mrf.mxu0 }
  0xd7   :  { %v259_v37 = vpop.f32.mrf.mxu1  ;;  %208 = vst [vmem:[%s383_s3 + $0x10] sm:$0xff] %v192_v32  ;;  %v190_v38 = vmax.f32 %v128_v34, 0.0  ;;  %v139_v40 = vadd.f32 %v251_v36, %v227_v25 }
  0xd8   :  { %216 = vst [vmem:[%s383_s3 + $0x50] sm:$0xff] %v200_v33  ;;  %v198_v39 = vmax.f32 %v160_v35, 0.0  ;;  %v171_v41 = vadd.f32 %v259_v37, %v227_v25  ;;  %v130_v42 = vpop.f32.mrf.mxu0 }
  0xd9   :  { %v162_v43 = vpop.f32.mrf.mxu1  ;;  %206 = vst [vmem:[%s383_s3] sm:$0xff] %v190_v38  ;;  %v193_v44 = vmax.f32 %v139_v40, 0.0  ;;  %v131_v46 = vadd.f32 %v227_v25, %v130_v42 }
  0xda   :  { %214 = vst [vmem:[%s383_s3 + $0x40] sm:$0xff] %v198_v39  ;;  %v201_v45 = vmax.f32 %v171_v41, 0.0  ;;  %v163_v47 = vadd.f32 %v227_v25, %v162_v43  ;;  %v254_v48 = vpop.f32.mrf.mxu0 }
  0xdb   :  { %v262_v49 = vpop.f32.mrf.mxu1  ;;  %209 = vst [vmem:[%s383_s3 + $0x18] sm:$0xff] %v193_v44  ;;  %v191_v50 = vmax.f32 %v131_v46, 0.0  ;;  %v152_v52 = vadd.f32 %v254_v48, %v227_v25 }
  0xdc   :  { %217 = vst [vmem:[%s383_s3 + $0x58] sm:$0xff] %v201_v45  ;;  %v199_v51 = vmax.f32 %v163_v47, 0.0  ;;  %v184_v53 = vadd.f32 %v262_v49, %v227_v25  ;;  %v143_v54 = vpop.f32.mrf.mxu0 }
  0xdd   :  { %v175_v55 = vpop.f32.mrf.mxu1  ;;  %207 = vst [vmem:[%s383_s3 + $0x8] sm:$0xff] %v191_v50  ;;  %v196_v56 = vmax.f32 %v152_v52, 0.0  ;;  %v144_v58 = vadd.f32 %v227_v25, %v143_v54 }
  0xde   :  { %215 = vst [vmem:[%s383_s3 + $0x48] sm:$0xff] %v199_v51  ;;  %v204_v57 = vmax.f32 %v184_v53, 0.0  ;;  %v176_v59 = vadd.f32 %v227_v25, %v175_v55  ;;  %v255_v60 = vpop.f32.mrf.mxu0 }
  0xdf   :  { %v263_v61 = vpop.f32.mrf.mxu1  ;;  %212 = vst [vmem:[%s383_s3 + $0x30] sm:$0xff] %v196_v56  ;;  %v194_v62 = vmax.f32 %v144_v58, 0.0  ;;  %v155_v0 = vadd.f32 %v255_v60, %v227_v25 }
  0xe0   :  { %220 = vst [vmem:[%s383_s3 + $0x70] sm:$0xff] %v204_v57  ;;  %v202_v63 = vmax.f32 %v176_v59, 0.0  ;;  %v187_v1 = vadd.f32 %v263_v61, %v227_v25  ;;  %v146_v2 = vpop.f32.mrf.mxu0 }
  0xe1   :  { %v178_v3 = vpop.f32.mrf.mxu1  ;;  %210 = vst [vmem:[%s383_s3 + $0x20] sm:$0xff] %v194_v62  ;;  %v197_v4 = vmax.f32 %v155_v0, 0.0  ;;  %v147_v6 = vadd.f32 %v227_v25, %v146_v2 }
  0xe2   :  { %218 = vst [vmem:[%s383_s3 + $0x60] sm:$0xff] %v202_v63  ;;  %v205_v5 = vmax.f32 %v187_v1, 0.0  ;;  %v179_v7 = vadd.f32 %v227_v25, %v178_v3 }
  0xe3   :  { %213 = vst [vmem:[%s383_s3 + $0x38] sm:$0xff] %v197_v4  ;;  %v195_v8 = vmax.f32 %v147_v6, 0.0 }
  0xe4   :  { %221 = vst [vmem:[%s383_s3 + $0x78] sm:$0xff] %v205_v5  ;;  %v203_v9 = vmax.f32 %v179_v7, 0.0 }
  0xe5   :  { %211 = vst [vmem:[%s383_s3 + $0x28] sm:$0xff] %v195_v8 }
  0xe6   :  { %219 = vst [vmem:[%s383_s3 + $0x68] sm:$0xff] %v203_v9 }
  0xe7   :  { %226 = vsyncpa [#allocation3], 1 }

// kernel: _lambda_.5
= control target key start
LH: loop header
LB: loop body
LE: loop exit
PB: predicated region body
PF: predicated region fallthrough
CT: control target
= control target key end

     0   :  { %vm57_vm0 = vcmask 130048   ;;  %s389_s1 = inlined_call_operand.vmem [shape: bf16[128,128], index: 1, kind: input, shape index: {}]   ;;  %s390_s4 = inlined_call_operand.vmem [shape: bf16[16,128], index: 4, kind: input, shape index: {}]   ;;  %s391_s3 = inlined_call_operand.vmem [shape: f32[32,16], index: 3, kind: input, shape index: {}]   ;;  %s392_s0 = inlined_call_operand.vmem [shape: f32[32,128], index: 0, kind: input, shape index: {}]   ;;  %s393_s2 = inlined_call_operand.vmem [shape: f32[1,128], index: 2, kind: input, shape index: {}]   ;;  %s394_s5 = inlined_call_operand.vmem [shape: f32[32,128], index: 5, kind: output, shape index: {}]  }
   0x1   :  { %v284_v0 = vld [vmem:[%s389_s1 + $0x38] sm:$0xff]   ;;  %v285_v1 = vld [vmem:[%s389_s1 + $0x30] sm:$0xff]   ;;  %v286_v2 = vld [vmem:[%s389_s1 + $0x28] sm:$0xff]  }
   0x2   :  { %264 = vmatprep.subr.bf16.mxu1 %v284_v0  ;;  %v290_v3 = vld [vmem:[%s390_s4] sm:$0xff]   ;;  %v44_v6 = vld [vmem:[%s391_s3 + $0x8] sm:$0xff]  ;;  %v45_v7 = vld [vmem:[%s391_s3 + $0x10] sm:$0xff] }
   0x3   :  { %265 = vmatpush3.bf16.msra.mxu1 %v284_v0  ;;  %v287_v4 = vld [vmem:[%s389_s1 + $0x20] sm:$0xff]   ;;  %258 = vmatprep.subr.bf16.mxu0 %v290_v3  ;;  %v46_v9 = vld [vmem:[%s391_s3 + $0x18] sm:$0xff]  ;;  %v22_v12 = vld [vmem:[%s392_s0 + $0x8] sm:$0xff] }
   0x4   :  { %266 = vmatprep.subr.bf16.mxu1 %v285_v1  ;;  %v43_v5 = vld [vmem:[%s391_s3] sm:$0xff]  ;;  %259 = vmatpush3.bf16.msra.mxu0 %v290_v3  ;;  %v48_v10 = vpack.c.bf16 %v46_v9, %v45_v7  ;;  %v288_v14 = vld [vmem:[%s389_s1 + $0x18] sm:$0xff]   ;;  %v289_v15 = vld [vmem:[%s389_s1 + $0x10] sm:$0xff]  }
   0x5   :  { %v47_v8 = vpack.c.bf16 %v44_v6, %v43_v5  ;;  %v21_v11 = vld [vmem:[%s392_s0] sm:$0xff]  ;;  %v291_v16 = vld [vmem:[%s389_s1 + $0x8] sm:$0xff]   ;;  %v23_v18 = vld [vmem:[%s392_s0 + $0x10] sm:$0xff] }
   0x6   :  { %v25_v13 = vpack.c.bf16 %v22_v12, %v21_v11  ;;  %v292_v17 = vld [vmem:[%s389_s1] sm:$0xff]   ;;  %v24_v19 = vld [vmem:[%s392_s0 + $0x18] sm:$0xff] }
   0x7   :  { %267 = vmatpush3.bf16.msra.mxu1 %v285_v1  ;;  %260 = vmatprep.mubr.msk.bf16.mxu0 %vm57_vm0, %v47_v8  ;;  %v26_v20 = vpack.c.bf16 %v24_v19, %v23_v18  ;;  %v244_v24 = vld [vmem:[%s393_s2] ss:$0 sm:$0xff] }
   0x8   :  { %268 = vmatprep.subr.bf16.mxu1 %v286_v2  ;;  %261 = vmatmul.mubr.msk.bf16.vlgmr.msra.gmra.mxu0 %vm57_vm0, %v48_v10 }
   0x9   :  { %280 = vmatprep.mubr.bf16.mxu1 %v25_v13 }
   0xb   :  { %269 = vmatpush3.bf16.msra.mxu1 %v286_v2 }
   0xc   :  { %270 = vmatprep.subr.bf16.mxu1 %v287_v4 }
   0xf   :  { %271 = vmatpush3.bf16.msra.mxu1 %v287_v4 }
  0x10   :  { %272 = vmatprep.subr.bf16.mxu1 %v288_v14 }
  0x13   :  { %273 = vmatpush3.bf16.msra.mxu1 %v288_v14 }
  0x14   :  { %274 = vmatprep.subr.bf16.mxu1 %v289_v15 }
  0x17   :  { %275 = vmatpush3.bf16.msra.mxu1 %v289_v15 }
  0x18   :  { %276 = vmatprep.subr.bf16.mxu1 %v291_v16 }
  0x1b   :  { %277 = vmatpush3.bf16.msra.mxu1 %v291_v16 }
  0x1c   :  { %278 = vmatprep.subr.bf16.mxu1 %v292_v17 }
  0x1f   :  { %279 = vmatpush3.bf16.msra.mxu1 %v292_v17 }
  0x22   :  { %281 = vmatmul.mubr.bf16.vlgmr.msra.gmra.mxu1 %v26_v20 }
  0xc8   :  { %v262_v21 = vpop.f32.mrf.mxu0 }
  0xca   :  { %v98_v22 = vpop.f32.mrf.mxu0 }
  0xcc   :  { %v263_v26 = vpop.f32.mrf.mxu0 }
  0xce   :  { %v101_v34 = vpop.f32.mrf.mxu0 }
  0xe2   :  { %v282_v23 = vpop.f32.mrf.mxu1 }
  0xe3   :  { %v204_v25 = vadd.f32 %v282_v23, %v262_v21 }
  0xe4   :  { %v195_v27 = vpop.f32.mrf.mxu1 }
  0xe5   :  { %v219_v28 = vadd.f32 %v244_v24, %v204_v25  ;;  %v196_v29 = vadd.f32 %v195_v27, %v98_v22 }
  0xe6   :  { %v283_v30 = vpop.f32.mrf.mxu1 }
  0xe7   :  { %v223_v31 = vmax.f32 %v219_v28, 0.0  ;;  %v217_v32 = vadd.f32 %v244_v24, %v196_v29  ;;  %v207_v33 = vadd.f32 %v283_v30, %v263_v26 }
  0xe8   :  { %v198_v35 = vpop.f32.mrf.mxu1 }
  0xe9   :  { %227 = vst [vmem:[%s394_s5 + $0x10] sm:$0xff] %v223_v31  ;;  %v221_v36 = vmax.f32 %v217_v32, 0.0  ;;  %v220_v37 = vadd.f32 %v244_v24, %v207_v33  ;;  %v199_v38 = vadd.f32 %v198_v35, %v101_v34 }
  0xeb   :  { %225 = vst [vmem:[%s394_s5] sm:$0xff] %v221_v36  ;;  %v224_v39 = vmax.f32 %v220_v37, 0.0  ;;  %v218_v40 = vadd.f32 %v244_v24, %v199_v38 }
  0xed   :  { %228 = vst [vmem:[%s394_s5 + $0x18] sm:$0xff] %v224_v39  ;;  %v222_v41 = vmax.f32 %v218_v40, 0.0 }
  0xef   :  { %226 = vst [vmem:[%s394_s5 + $0x8] sm:$0xff] %v222_v41 }

// kernel: _lambda_.4
= control target key start
LH: loop header
LB: loop body
LE: loop exit
PB: predicated region body
PF: predicated region fallthrough
CT: control target
= control target key end

     0   :  { %s1603_s1 = inlined_call_operand.vmem [shape: bf16[1152,128], index: 1, kind: input, shape index: {}]   ;;  %s1604_s0 = inlined_call_operand.vmem [shape: bf16[32,1152], index: 0, kind: input, shape index: {}]   ;;  %s1605_s2 = inlined_call_operand.vmem [shape: f32[1,128], index: 2, kind: input, shape index: {}]   ;;  %s1606_s3 = inlined_call_operand.vmem [shape: f32[32,128], index: 3, kind: output, shape index: {}]  }
   0x1   :  { %v1200_v0 = vld [vmem:[%s1603_s1 + $0x78] sm:$0xff]   ;;  %v1204_v4 = vld [vmem:[%s1603_s1 + $0x70] sm:$0xff]   ;;  %v1208_v8 = vld [vmem:[%s1603_s1 + $0x68] sm:$0xff]  }
   0x2   :  { %v1201_v1 = vld [vmem:[%s1603_s1 + $0x38] sm:$0xff]   ;;  %1058 = vmatprep.subr.bf16.mxu0 %v1200_v0  ;;  %v1205_v5 = vld [vmem:[%s1603_s1 + $0x30] sm:$0xff]   ;;  %v1209_v9 = vld [vmem:[%s1603_s1 + $0x28] sm:$0xff]  }
   0x3   :  { %v1202_v2 = vld [vmem:[%s1603_s1 + $0xf8] sm:$0xff]   ;;  %1059 = vmatpush3.bf16.msra.mxu0 %v1201_v1  ;;  %v1206_v6 = vld [vmem:[%s1603_s1 + $0xf0] sm:$0xff]   ;;  %v1210_v10 = vld [vmem:[%s1603_s1 + $0xe8] sm:$0xff]  }
   0x4   :  { %v1203_v3 = vld [vmem:[%s1603_s1 + $0xb8] sm:$0xff]   ;;  %1086 = vmatprep.subr.bf16.mxu1 %v1202_v2  ;;  %1060 = vmatprep.subr.bf16.mxu0 %v1204_v4  ;;  %v1207_v7 = vld [vmem:[%s1603_s1 + $0xb0] sm:$0xff]   ;;  %v1211_v11 = vld [vmem:[%s1603_s1 + $0xa8] sm:$0xff]  }
   0x5   :  { %1087 = vmatpush3.bf16.msra.mxu1 %v1203_v3  ;;  %v1212_v12 = vld [vmem:[%s1603_s1 + $0x60] sm:$0xff]   ;;  %v1216_v16 = vld [vmem:[%s1603_s1 + $0x58] sm:$0xff]   ;;  %v1220_v20 = vld [vmem:[%s1603_s1 + $0x50] sm:$0xff]  }
   0x6   :  { %1088 = vmatprep.subr.bf16.mxu1 %v1206_v6  ;;  %v1213_v13 = vld [vmem:[%s1603_s1 + $0x20] sm:$0xff]   ;;  %v1217_v17 = vld [vmem:[%s1603_s1 + $0x18] sm:$0xff]   ;;  %v1221_v21 = vld [vmem:[%s1603_s1 + $0x10] sm:$0xff]  }
   0x7   :  { %1061 = vmatpush3.bf16.msra.mxu0 %v1205_v5  ;;  %v1214_v14 = vld [vmem:[%s1603_s1 + $0xe0] sm:$0xff]   ;;  %v1218_v18 = vld [vmem:[%s1603_s1 + $0xd8] sm:$0xff]   ;;  %v1222_v22 = vld [vmem:[%s1603_s1 + $0xd0] sm:$0xff]  }
   0x8   :  { %1062 = vmatprep.subr.bf16.mxu0 %v1208_v8  ;;  %v1215_v15 = vld [vmem:[%s1603_s1 + $0xa0] sm:$0xff]   ;;  %v1219_v19 = vld [vmem:[%s1603_s1 + $0x98] sm:$0xff]   ;;  %v1223_v23 = vld [vmem:[%s1603_s1 + $0x90] sm:$0xff]  }
   0x9   :  { %1089 = vmatpush3.bf16.msra.mxu1 %v1207_v7  ;;  %v1224_v24 = vld [vmem:[%s1603_s1 + $0x48] sm:$0xff]   ;;  %v1228_v28 = vld [vmem:[%s1603_s1 + $0x40] sm:$0xff]   ;;  %v1235_v34 = vld [vmem:[%s1603_s1 + $0x178] sm:$0xff]  }
   0xa   :  { %1090 = vmatprep.subr.bf16.mxu1 %v1210_v10  ;;  %v1225_v25 = vld [vmem:[%s1603_s1 + $0x8] sm:$0xff]   ;;  %v1229_v29 = vld [vmem:[%s1603_s1] sm:$0xff]   ;;  %v1239_v37 = vld [vmem:[%s1603_s1 + $0x138] sm:$0xff]  }
   0xb   :  { %1063 = vmatpush3.bf16.msra.mxu0 %v1209_v9  ;;  %v1226_v26 = vld [vmem:[%s1603_s1 + $0xc8] sm:$0xff]   ;;  %v1230_v30 = vld [vmem:[%s1603_s1 + $0xc0] sm:$0xff]   ;;  %v1240_v38 = vld [vmem:[%s1603_s1 + $0x1f8] sm:$0xff]  }
   0xc   :  { %1064 = vmatprep.subr.bf16.mxu0 %v1212_v12  ;;  %v1227_v27 = vld [vmem:[%s1603_s1 + $0x88] sm:$0xff]   ;;  %v1231_v31 = vld [vmem:[%s1604_s0] ss:$36 sps:$4 sm:$0xff]   ;;  %v1241_v39 = vld [vmem:[%s1603_s1 + $0x1b8] sm:$0xff]  }
   0xd   :  { %1091 = vmatpush3.bf16.msra.mxu1 %v1211_v11  ;;  %v1233_v32 = vld [vmem:[%s1604_s0 + $0x4] ss:$36 sps:$4 sm:$0xff]   ;;  %v1238_v36 = vld [vmem:[%s1604_s0 + $0xc] ss:$36 sps:$4 sm:$0xff]   ;;  %v1254_v52 = vld [vmem:[%s1603_s1 + $0x158] sm:$0xff]  }
   0xe   :  { %1092 = vmatprep.subr.bf16.mxu1 %v1214_v14  ;;  %v1234_v33 = vld [vmem:[%s1603_s1 + $0x80] sm:$0xff]   ;;  %742 = vmatprep.mubr.bf16.mxu0 %v1233_v32  ;;  %v1236_v35 = vld [vmem:[%s1604_s0 + $0x8] ss:$36 sps:$4 sm:$0xff]   ;;  %v1242_v40 = vld [vmem:[%s1603_s1 + $0x170] sm:$0xff]  }
   0xf   :  { %1065 = vmatpush3.bf16.msra.mxu0 %v1213_v13  ;;  %791 = vmatprep.mubr.bf16.mxu1 %v1238_v36  ;;  %v1243_v41 = vld [vmem:[%s1603_s1 + $0x130] sm:$0xff]   ;;  %v1246_v44 = vld [vmem:[%s1603_s1 + $0x168] sm:$0xff]   ;;  %v1250_v48 = vld [vmem:[%s1603_s1 + $0x160] sm:$0xff]  }
  0x10   :  { %1066 = vmatprep.subr.bf16.mxu0 %v1216_v16  ;;  %v1244_v42 = vld [vmem:[%s1603_s1 + $0x1f0] sm:$0xff]   ;;  %v1247_v45 = vld [vmem:[%s1603_s1 + $0x128] sm:$0xff]   ;;  %v1251_v49 = vld [vmem:[%s1603_s1 + $0x120] sm:$0xff]  }
  0x11   :  { %1093 = vmatpush3.bf16.msra.mxu1 %v1215_v15  ;;  %v1245_v43 = vld [vmem:[%s1603_s1 + $0x1b0] sm:$0xff]   ;;  %v1248_v46 = vld [vmem:[%s1603_s1 + $0x1e8] sm:$0xff]   ;;  %v1252_v50 = vld [vmem:[%s1603_s1 + $0x1e0] sm:$0xff]  }
  0x12   :  { %1094 = vmatprep.subr.bf16.mxu1 %v1218_v18  ;;  %v1249_v47 = vld [vmem:[%s1603_s1 + $0x1a8] sm:$0xff]   ;;  %v1253_v51 = vld [vmem:[%s1603_s1 + $0x1a0] sm:$0xff]   ;;  %v1255_v53 = vld [vmem:[%s1603_s1 + $0x118] sm:$0xff]  }
  0x13   :  { %1067 = vmatpush3.bf16.msra.mxu0 %v1217_v17  ;;  %v1256_v54 = vld [vmem:[%s1604_s0 + $0x4c] ss:$36 sps:$4 sm:$0xff]   ;;  %v1258_v55 = vld [vmem:[%s1603_s1 + $0x1d8] sm:$0xff]   ;;  %v1272_v4 = vld [vmem:[%s1603_s1 + $0x140] sm:$0xff]  }
  0x14   :  { %1068 = vmatprep.subr.bf16.mxu0 %v1220_v20  ;;  %v1259_v56 = vld [vmem:[%s1604_s0 + $0x48] ss:$36 sps:$4 sm:$0xff]   ;;  %v1260_v57 = vld [vmem:[%s1603_s1 + $0x198] sm:$0xff]   ;;  %v1263_v59 = vld [vmem:[%s1603_s1 + $0x150] sm:$0xff]  }
  0x15   :  { %1095 = vmatpush3.bf16.msra.mxu1 %v1219_v19  ;;  %v1261_v58 = vld [vmem:[%s1604_s0 + $0x54] ss:$36 sps:$4 sm:$0xff]   ;;  %v1268_v0 = vld [vmem:[%s1603_s1 + $0x148] sm:$0xff]   ;;  %v1273_v5 = vld [vmem:[%s1603_s1 + $0x100] sm:$0xff]  }
  0x16   :  { %1096 = vmatprep.subr.bf16.mxu1 %v1222_v22  ;;  %v1264_v60 = vld [vmem:[%s1604_s0 + $0x50] ss:$36 sps:$4 sm:$0xff]   ;;  %v1269_v1 = vld [vmem:[%s1603_s1 + $0x108] sm:$0xff]   ;;  %v1274_v6 = vld [vmem:[%s1603_s1 + $0x1c0] sm:$0xff]  }
  0x17   :  { %1069 = vmatpush3.bf16.msra.mxu0 %v1221_v21  ;;  %v1265_v61 = vld [vmem:[%s1603_s1 + $0x110] sm:$0xff]   ;;  %v1270_v2 = vld [vmem:[%s1603_s1 + $0x1c8] sm:$0xff]   ;;  %v1278_v9 = vld [vmem:[%s1603_s1 + $0x180] sm:$0xff]  }
  0x18   :  { %1070 = vmatprep.subr.bf16.mxu0 %v1224_v24  ;;  %v1266_v62 = vld [vmem:[%s1603_s1 + $0x1d0] sm:$0xff]   ;;  %v1271_v3 = vld [vmem:[%s1603_s1 + $0x188] sm:$0xff]   ;;  %v1279_v10 = vld [vmem:[%s1603_s1 + $0x238] sm:$0xff]  }
  0x19   :  { %1097 = vmatpush3.bf16.msra.mxu1 %v1223_v23  ;;  %v1267_v63 = vld [vmem:[%s1603_s1 + $0x190] sm:$0xff]   ;;  %v1280_v11 = vld [vmem:[%s1604_s0 + $0x18] ss:$36 sps:$4 sm:$0xff]   ;;  %v1287_v16 = vld [vmem:[%s1603_s1 + $0x228] sm:$0xff]  }
  0x1a   :  { %1098 = vmatprep.subr.bf16.mxu1 %v1226_v26  ;;  %v1275_v7 = vld [vmem:[%s1604_s0 + $0x10] ss:$36 sps:$4 sm:$0xff]   ;;  %v1282_v12 = vld [vmem:[%s1604_s0 + $0x1c] ss:$36 sps:$4 sm:$0xff]   ;;  %v1288_v17 = vld [vmem:[%s1604_s0 + $0x64] ss:$36 sps:$4 sm:$0xff]  }
  0x1b   :  { %1071 = vmatpush3.bf16.msra.mxu0 %v1225_v25  ;;  %v1277_v8 = vld [vmem:[%s1604_s0 + $0x14] ss:$36 sps:$4 sm:$0xff]   ;;  %v1284_v14 = vld [vmem:[%s1604_s0 + $0x5c] ss:$36 sps:$4 sm:$0xff]   ;;  %v1294_v23 = vld [vmem:[%s1603_s1 + $0x208] sm:$0xff]  }
  0x1c   :  { %1072 = vmatprep.subr.bf16.mxu0 %v1228_v28  ;;  %v1283_v13 = vld [vmem:[%s1603_s1 + $0x230] sm:$0xff]   ;;  %v1286_v15 = vld [vmem:[%s1604_s0 + $0x58] ss:$36 sps:$4 sm:$0xff]   ;;  %v1290_v18 = vld [vmem:[%s1604_s0 + $0x60] ss:$36 sps:$4 sm:$0xff]  }
  0x1d   :  { %1099 = vmatpush3.bf16.msra.mxu1 %v1227_v27  ;;  %v1291_v19 = vld [vmem:[%s1603_s1 + $0x220] sm:$0xff]   ;;  %v1292_v20 = vld [vmem:[%s1603_s1 + $0x218] sm:$0xff]   ;;  %v1293_v22 = vld [vmem:[%s1603_s1 + $0x210] sm:$0xff]  }
  0x1e   :  { %1100 = vmatprep.subr.bf16.mxu1 %v1230_v30  ;;  %v1296_v21 = vld [vmem:[%s1604_s0 + $0x20] ss:$36 sps:$4 sm:$0xff]   ;;  %v1297_v25 = vld [vmem:[%s1604_s0 + $0x68] ss:$36 sps:$4 sm:$0xff]  }
  0x1f   :  { %1073 = vmatpush3.bf16.msra.mxu0 %v1229_v29  ;;  %v1295_v24 = vld [vmem:[%s1603_s1 + $0x200] sm:$0xff]  }
  0x20   :  { %1114 = vmatprep.subr.bf16.mxu0 %v1235_v34 }
  0x21   :  { %1101 = vmatpush3.bf16.msra.mxu1 %v1234_v33 }
  0x22   :  { %743 = vmatmul.mubr.bf16.vlgmr.msra.gmra.mxu0 %v1231_v31  ;;  %1142 = vmatprep.subr.bf16.mxu1 %v1240_v38 }
  0x23   :  { %1115 = vmatpush3.bf16.msra.mxu0 %v1239_v37  ;;  %750 = vmatprep.mubr.bf16.mxu0 %v1256_v54 }
  0x24   :  { %792 = vmatmul.mubr.bf16.vlgmr.msra.gmra.mxu1 %v1236_v35  ;;  %1116 = vmatprep.subr.bf16.mxu0 %v1242_v40 }
  0x25   :  { %1143 = vmatpush3.bf16.msra.mxu1 %v1241_v39  ;;  %799 = vmatprep.mubr.bf16.mxu1 %v1261_v58 }
  0x26   :  { %1144 = vmatprep.subr.bf16.mxu1 %v1244_v42 }
  0x27   :  { %1117 = vmatpush3.bf16.msra.mxu0 %v1243_v41 }
  0x28   :  { %1118 = vmatprep.subr.bf16.mxu0 %v1246_v44 }
  0x29   :  { %1145 = vmatpush3.bf16.msra.mxu1 %v1245_v43 }
  0x2a   :  { %1146 = vmatprep.subr.bf16.mxu1 %v1248_v46  ;;  %751 = vmatmul.mubr.bf16.gmra.mxu0 %v1259_v56 }
  0x2b   :  { %1119 = vmatpush3.bf16.msra.mxu0 %v1247_v45  ;;  %840 = vmatprep.mubr.bf16.mxu0 %v1277_v8 }
  0x2c   :  { %1120 = vmatprep.subr.bf16.mxu0 %v1250_v48  ;;  %800 = vmatmul.mubr.bf16.gmra.mxu1 %v1264_v60 }
  0x2d   :  { %1147 = vmatpush3.bf16.msra.mxu1 %v1249_v47  ;;  %889 = vmatprep.mubr.bf16.mxu1 %v1282_v12 }
  0x2e   :  { %1148 = vmatprep.subr.bf16.mxu1 %v1252_v50 }
  0x2f   :  { %1121 = vmatpush3.bf16.msra.mxu0 %v1251_v49 }
  0x30   :  { %1122 = vmatprep.subr.bf16.mxu0 %v1254_v52 }
  0x31   :  { %1149 = vmatpush3.bf16.msra.mxu1 %v1253_v51 }
  0x32   :  { %1150 = vmatprep.subr.bf16.mxu1 %v1258_v55  ;;  %v967_v55 = vld [vmem:[%s1605_s2] ss:$0 sm:$0xff] }
  0x33   :  { %1123 = vmatpush3.bf16.msra.mxu0 %v1255_v53 }
  0x34   :  { %1124 = vmatprep.subr.bf16.mxu0 %v1263_v59 }
  0x35   :  { %1151 = vmatpush3.bf16.msra.mxu1 %v1260_v57 }
  0x36   :  { %1152 = vmatprep.subr.bf16.mxu1 %v1266_v62 }
  0x37   :  { %1125 = vmatpush3.bf16.msra.mxu0 %v1265_v61 }
  0x38   :  { %1126 = vmatprep.subr.bf16.mxu0 %v1268_v0 }
  0x39   :  { %1153 = vmatpush3.bf16.msra.mxu1 %v1267_v63 }
  0x3a   :  { %1154 = vmatprep.subr.bf16.mxu1 %v1270_v2 }
  0x3b   :  { %1127 = vmatpush3.bf16.msra.mxu0 %v1269_v1 }
  0x3c   :  { %1128 = vmatprep.subr.bf16.mxu0 %v1272_v4 }
  0x3d   :  { %1155 = vmatpush3.bf16.msra.mxu1 %v1271_v3 }
  0x3e   :  { %1156 = vmatprep.subr.bf16.mxu1 %v1274_v6 }
  0x3f   :  { %1129 = vmatpush3.bf16.msra.mxu0 %v1273_v5 }
  0x40   :  { %1180 = vmatprep.subr.bf16.mxu0 %v1279_v10 }
  0x41   :  { %1157 = vmatpush3.bf16.msra.mxu1 %v1278_v9 }
  0x42   :  { %841 = vmatmul.mubr.bf16.vlgmr.msra.gmra.mxu0 %v1275_v7 }
  0x43   :  { %1181 = vmatpush3.bf16.msra.mxu0 %v1279_v10  ;;  %848 = vmatprep.mubr.bf16.mxu0 %v1284_v14 }
  0x44   :  { %890 = vmatmul.mubr.bf16.vlgmr.msra.gmra.mxu1 %v1280_v11  ;;  %1182 = vmatprep.subr.bf16.mxu0 %v1283_v13 }
  0x45   :  { %897 = vmatprep.mubr.bf16.mxu1 %v1288_v17 }
  0x47   :  { %1183 = vmatpush3.bf16.msra.mxu0 %v1283_v13 }
  0x48   :  { %1184 = vmatprep.subr.bf16.mxu0 %v1287_v16 }
  0x4a   :  { %849 = vmatmul.mubr.bf16.gmra.mxu0 %v1286_v15 }
  0x4b   :  { %1185 = vmatpush3.bf16.msra.mxu0 %v1287_v16  ;;  %1196 = vmatprep.mubr.bf16.mxu0 %v1296_v21 }
  0x4c   :  { %898 = vmatmul.mubr.bf16.gmra.mxu1 %v1290_v18  ;;  %1186 = vmatprep.subr.bf16.mxu0 %v1291_v19 }
  0x4f   :  { %1187 = vmatpush3.bf16.msra.mxu0 %v1291_v19 }
  0x50   :  { %1188 = vmatprep.subr.bf16.mxu0 %v1292_v20 }
  0x53   :  { %1189 = vmatpush3.bf16.msra.mxu0 %v1292_v20 }
  0x54   :  { %1190 = vmatprep.subr.bf16.mxu0 %v1293_v22 }
  0x57   :  { %1191 = vmatpush3.bf16.msra.mxu0 %v1293_v22 }
  0x58   :  { %1192 = vmatprep.subr.bf16.mxu0 %v1294_v23 }
  0x5b   :  { %1193 = vmatpush3.bf16.msra.mxu0 %v1294_v23 }
  0x5c   :  { %1194 = vmatprep.subr.bf16.mxu0 %v1295_v24 }
  0x5f   :  { %1195 = vmatpush3.bf16.msra.mxu0 %v1295_v24 }
  0x62   :  { %1197 = vmatmul.mubr.bf16.vlgmr.msra.gmra.mxu0 %v1297_v25 }
  0xe2   :  { %v1074_v26 = vpop.f32.mrf.mxu0 }
  0xe4   :  { %v1102_v27 = vpop.f32.mrf.mxu1  ;;  %v1075_v28 = vpop.f32.mrf.mxu0 }
  0xe5   :  { %v1076_v54 = vadd.f32 %v1075_v28, %v1074_v26 }
  0xe6   :  { %v1103_v29 = vpop.f32.mrf.mxu1  ;;  %v1077_v30 = vpop.f32.mrf.mxu0 }
  0xe7   :  { %v745_v61 = vadd.f32 %v1076_v54, %v967_v55  ;;  %v1104_v62 = vadd.f32 %v1103_v29, %v1102_v27 }
  0xe8   :  { %v1105_v31 = vpop.f32.mrf.mxu1  ;;  %v1078_v32 = vpop.f32.mrf.mxu0 }
  0xe9   :  { %v1079_v63 = vadd.f32 %v1078_v32, %v1077_v30  ;;  %v794_v7 = vadd.f32 %v1104_v62, %v745_v61 }
  0xea   :  { %v1080_v33 = vpop.f32.mrf.mxu0  ;;  %v1106_v34 = vpop.f32.mrf.mxu1 }
  0xeb   :  { %v748_v8 = vadd.f32 %v1079_v63, %v967_v55  ;;  %v1107_v9 = vadd.f32 %v1106_v34, %v1105_v31 }
  0xec   :  { %v1108_v35 = vpop.f32.mrf.mxu1  ;;  %v1081_v36 = vpop.f32.mrf.mxu0 }
  0xed   :  { %v1082_v53 = vadd.f32 %v1081_v36, %v1080_v33  ;;  %v797_v18 = vadd.f32 %v1107_v9, %v748_v8 }
  0xee   :  { %v1109_v37 = vpop.f32.mrf.mxu1  ;;  %v1083_v38 = vpop.f32.mrf.mxu0 }
  0xef   :  { %v753_v58 = vadd.f32 %v1082_v53, %v967_v55  ;;  %v1110_v59 = vadd.f32 %v1109_v37, %v1108_v35 }
  0xf0   :  { %v1111_v39 = vpop.f32.mrf.mxu1  ;;  %v1084_v40 = vpop.f32.mrf.mxu0 }
  0xf1   :  { %v1085_v60 = vadd.f32 %v1084_v40, %v1083_v38  ;;  %v802_v3 = vadd.f32 %v1110_v59, %v753_v58 }
  0xf2   :  { %v1112_v42 = vpop.f32.mrf.mxu1 }
  0xf3   :  { %v756_v4 = vadd.f32 %v1085_v60, %v967_v55  ;;  %v1113_v5 = vadd.f32 %v1112_v42, %v1111_v39 }
  0xf5   :  { %v805_v14 = vadd.f32 %v1113_v5, %v756_v4 }
 0x102   :  { %v1130_v41 = vpop.f32.mrf.mxu0 }
 0x104   :  { %v1131_v43 = vpop.f32.mrf.mxu0  ;;  %v1158_v44 = vpop.f32.mrf.mxu1 }
 0x105   :  { %v1132_v6 = vadd.f32 %v1131_v43, %v1130_v41 }
 0x106   :  { %v1133_v45 = vpop.f32.mrf.mxu0  ;;  %v1159_v46 = vpop.f32.mrf.mxu1 }
 0x107   :  { %v843_v15 = vadd.f32 %v1132_v6, %v794_v7  ;;  %v1160_v16 = vadd.f32 %v1159_v46, %v1158_v44 }
 0x108   :  { %v1134_v47 = vpop.f32.mrf.mxu0  ;;  %v1161_v48 = vpop.f32.mrf.mxu1 }
 0x109   :  { %v1135_v17 = vadd.f32 %v1134_v47, %v1133_v45  ;;  %v892_v26 = vadd.f32 %v1160_v16, %v843_v15 }
 0x10a   :  { %v1136_v49 = vpop.f32.mrf.mxu0  ;;  %v1162_v50 = vpop.f32.mrf.mxu1 }
 0x10b   :  { %v846_v23 = vadd.f32 %v1135_v17, %v797_v18  ;;  %v1163_v24 = vadd.f32 %v1162_v50, %v1161_v48 }
 0x10c   :  { %v1137_v51 = vpop.f32.mrf.mxu0  ;;  %v1164_v52 = vpop.f32.mrf.mxu1 }
 0x10d   :  { %v1138_v0 = vadd.f32 %v1137_v51, %v1136_v49  ;;  %v895_v34 = vadd.f32 %v1163_v24, %v846_v23 }
 0x10e   :  { %v1139_v56 = vpop.f32.mrf.mxu0  ;;  %v1165_v57 = vpop.f32.mrf.mxu1 }
 0x10f   :  { %v851_v10 = vadd.f32 %v1138_v0, %v802_v3  ;;  %v1166_v11 = vadd.f32 %v1165_v57, %v1164_v52 }
 0x110   :  { %v1140_v1 = vpop.f32.mrf.mxu0  ;;  %v1167_v2 = vpop.f32.mrf.mxu1 }
 0x111   :  { %v1141_v12 = vadd.f32 %v1140_v1, %v1139_v56  ;;  %v900_v21 = vadd.f32 %v1166_v11, %v851_v10 }
 0x112   :  { %v1168_v13 = vpop.f32.mrf.mxu1 }
 0x113   :  { %v854_v19 = vadd.f32 %v1141_v12, %v805_v14  ;;  %v1169_v20 = vadd.f32 %v1168_v13, %v1167_v2 }
 0x115   :  { %v903_v30 = vadd.f32 %v1169_v20, %v854_v19 }
 0x122   :  { %v1198_v22 = vpop.f32.mrf.mxu0 }
 0x123   :  { %v949_v25 = vadd.f32 %v1198_v22, %v900_v21 }
 0x124   :  { %v940_v27 = vpop.f32.mrf.mxu0 }
 0x125   :  { %v957_v28 = vmax.f32 %v949_v25, 0.0  ;;  %v941_v29 = vadd.f32 %v940_v27, %v892_v26 }
 0x126   :  { %v1199_v31 = vpop.f32.mrf.mxu0 }
 0x127   :  { %961 = vst [vmem:[%s1606_s3 + $0x10] sm:$0xff] %v957_v28  ;;  %v955_v32 = vmax.f32 %v941_v29, 0.0  ;;  %v952_v33 = vadd.f32 %v1199_v31, %v903_v30 }
 0x128   :  { %v943_v35 = vpop.f32.mrf.mxu0 }
 0x129   :  { %959 = vst [vmem:[%s1606_s3] sm:$0xff] %v955_v32  ;;  %v958_v36 = vmax.f32 %v952_v33, 0.0  ;;  %v944_v37 = vadd.f32 %v943_v35, %v895_v34 }
 0x12b   :  { %962 = vst [vmem:[%s1606_s3 + $0x18] sm:$0xff] %v958_v36  ;;  %v956_v38 = vmax.f32 %v944_v37, 0.0 }
 0x12d   :  { %960 = vst [vmem:[%s1606_s3 + $0x8] sm:$0xff] %v956_v38 }

</bundles_post_ra>
